<compile_context>
chip_gen: v7x
topology: tpu7x:2x2x1
jax: 0.10.0
libtpu: 0.0.40
codegen_flags: <defaults>
</compile_context>

<pallas_src>
import jax
import jax.numpy as jnp
from jax import lax
from jax.experimental import pallas as pl
from jax.experimental.pallas import tpu as pltpu

D_IN = 768
MAX_SEQ_LEN = 60
SENTIMENTS = 3
CATEGORIES = 23                      # sub_only=False
D_OUT = SENTIMENTS * CATEGORIES      # 69
D_OUT_PAD = 128                      # lane-dense output width (multiple of 128)
D_HALF = D_IN // 2                   # 384 packed uint32 lanes per embedding row


def _make_kernel(tb: int, seq_len: int):
    inv_l = 1.0 / float(seq_len)

    def kernel(ids_ref, emb_hbm, w_even_ref, w_odd_ref, b_ref, o_ref, h_buf, sem):
        # ids_ref    : SMEM [B_pad, L]       int32   (scalar prefetch)
        # emb_hbm    : HBM  [V, D_HALF]      uint32  (bf16 pairs packed; even d in low 16 bits)
        # w_even/odd : VMEM [D_HALF, 128]    f32     (rows 0::2 / 1::2 of the padded weight)
        # b_ref      : VMEM [1, 128]         f32
        # o_ref      : VMEM [TB, 128]        f32
        # h_buf      : VMEM [TB, L, D_HALF]  uint32  (gather scratch)
        row0 = pl.program_id(0) * tb

        # ---- fused embedding gather: TB*L row DMAs HBM -> VMEM, all overlapped ----
        @pl.loop(0, tb)
        def _(bb):
            @pl.loop(0, seq_len)
            def _(ll):
                tok = ids_ref[row0 + bb, ll]
                pltpu.make_async_copy(emb_hbm.at[tok], h_buf.at[bb, ll], sem.at[0]).start()

        # Single aggregated wait: the DMA semaphore accumulates bytes from every row copy;
        # a descriptor covering the full gather buffer waits for (and consumes) all of them.
        pltpu.make_async_copy(h_buf, h_buf, sem.at[0]).wait()

        # ---- unpack bf16 pairs -> f32 (keep f32 for reduce/EUP math: required on v5e) ----
        u = h_buf[...]                                                   # [TB, L, D_HALF] u32
        h_even = pltpu.bitcast(u << 16, jnp.float32)                     # features d = 0,2,4,...
        h_odd = pltpu.bitcast(u & jnp.uint32(0xFFFF0000), jnp.float32)   # features d = 1,3,5,...

        # ---- AvgPool1d(kernel = L = 60) over the sequence axis ----
        pooled_even = jnp.sum(h_even, axis=1) * inv_l                    # [TB, D_HALF]
        pooled_odd = jnp.sum(h_odd, axis=1) * inv_l                      # [TB, D_HALF]

        # ---- Linear(768 -> 128-padded) + Sigmoid, lane-dense store ----
        logits = (
            jnp.dot(pooled_even, w_even_ref[...], preferred_element_type=jnp.float32)
            + jnp.dot(pooled_odd, w_odd_ref[...], preferred_element_type=jnp.float32)
            + b_ref[...]
        )
        o_ref[...] = jax.nn.sigmoid(logits).astype(o_ref.dtype)

    return kernel


def pack_embedding_bf16(table_f32):
    """Quantize a [V, 768] f32 table to bf16 and pack lane-adjacent pairs into uint32.

    Even feature indices land in the low 16 bits of each word (matches the in-kernel unpack).
    Returns (bf16 table for reference use, packed uint32 table for the kernel).
    """
    tab_bf16 = table_f32.astype(jnp.bfloat16)
    u16 = lax.bitcast_convert_type(tab_bf16, jnp.uint16).astype(jnp.uint32)   # [V, 768]
    packed = u16[:, 0::2] | (u16[:, 1::2] << 16)                              # [V, 384]
    return tab_bf16, packed


def cartesian2_head(input_ids, emb_packed, weight_t, bias, *, tb: int = 8):
    """input_ids [B, L] int32, emb_packed [V, 384] uint32, weight_t [768, 69] f32,
    bias [69] f32 -> sigmoid(mean_L(emb[ids]) @ W + b), shape [B, 69]."""
    B, L = input_ids.shape
    _, dh = emb_packed.shape
    assert L == MAX_SEQ_LEN and dh == D_HALF
    assert weight_t.shape == (D_IN, D_OUT) and bias.shape == (D_OUT,)

    # batch tiling; pad B up to a multiple of the tile (padded rows reuse token id 0)
    tb = max(1, min(tb, B))
    b_pad = pl.cdiv(B, tb) * tb
    if b_pad != B:
        input_ids = jnp.pad(input_ids, ((0, b_pad - B), (0, 0)))

    # lane-dense classifier: zero-pad 69 -> 128 output columns; split even/odd input rows
    w_full = jnp.zeros((D_IN, D_OUT_PAD), jnp.float32).at[:, :D_OUT].set(weight_t)
    w_even = w_full[0::2, :]                                   # [384, 128]
    w_odd = w_full[1::2, :]                                    # [384, 128]
    bias_pad = jnp.zeros((1, D_OUT_PAD), jnp.float32).at[0, :D_OUT].set(bias)

    out = pl.pallas_call(
        _make_kernel(tb, L),
        out_shape=jax.ShapeDtypeStruct((b_pad, D_OUT_PAD), jnp.float32),
        grid_spec=pltpu.PrefetchScalarGridSpec(
            num_scalar_prefetch=1,
            grid=(b_pad // tb,),
            in_specs=[
                pl.BlockSpec(memory_space=pl.ANY),                           # packed table (HBM)
                pl.BlockSpec((D_HALF, D_OUT_PAD), lambda i, ids: (0, 0)),    # resident weight (even)
                pl.BlockSpec((D_HALF, D_OUT_PAD), lambda i, ids: (0, 0)),    # resident weight (odd)
                pl.BlockSpec((1, D_OUT_PAD), lambda i, ids: (0, 0)),         # resident bias
            ],
            out_specs=pl.BlockSpec((tb, D_OUT_PAD), lambda i, ids: (i, 0)),
            scratch_shapes=[
                pltpu.VMEM((tb, L, D_HALF), jnp.uint32),                     # gather buffer
                pltpu.SemaphoreType.DMA((1,)),
            ],
        ),
        compiler_params=pltpu.CompilerParams(
            dimension_semantics=("parallel",),                               # v7x: 2 TCs split tiles
        ),
    )(input_ids, emb_packed, w_even, w_odd, bias_pad)

    return out[:B, :D_OUT]


def cartesian2_forward(input_ids, attention_mask, params):
    """Matches Cartesian2.forward semantics (BERT replaced by a synthetic embedding)."""
    del attention_mask  # reference AvgPool1d pools the full 60-token window regardless of mask
    return cartesian2_head(input_ids, params["emb_packed"], params["w_t"], params["b"])


if __name__ == "__main__":
    key = jax.random.PRNGKey(0)
    k_emb, k_w, k_b, k_ids = jax.random.split(key, 4)

    B = 2
    VOCAB = 128

    # synthetic "BERT" embedding table (deterministic), stored bf16-packed for the kernel
    emb_f32 = jax.random.normal(k_emb, (VOCAB, D_IN), dtype=jnp.float32) * 0.02
    emb_bf16, emb_packed = pack_embedding_bf16(emb_f32)

    # nn.Linear(768, 69): weight [D_OUT, D_IN]; kernel consumes its transpose [D_IN, D_OUT]
    w_t = (jax.random.normal(k_w, (D_OUT, D_IN), dtype=jnp.float32) * 0.02).T
    b = jax.random.normal(k_b, (D_OUT,), dtype=jnp.float32) * 0.02

    params = {"emb_packed": emb_packed, "w_t": w_t, "b": b}

    input_ids = jax.random.randint(k_ids, (B, MAX_SEQ_LEN), 0, VOCAB, dtype=jnp.int32)
    attention_mask = jnp.ones((B, MAX_SEQ_LEN), dtype=jnp.int32)

    out = cartesian2_forward(input_ids, attention_mask, params)
    out = jax.block_until_ready(out)

    # pure-JAX reference (same bf16-quantized table, f32 math)
    hidden = emb_bf16[input_ids].astype(jnp.float32)                # [B, L, D_IN]
    pooled = jnp.mean(hidden, axis=1)                               # [B, D_IN]
    ref = jax.nn.sigmoid(
        jnp.dot(pooled, w_t, precision=lax.Precision.HIGHEST) + b[None, :]
    )

    assert out.shape == (B, D_OUT), out.shape
    max_err = float(jnp.max(jnp.abs(out - ref)))
    assert jnp.allclose(out, ref, atol=1e-5, rtol=1e-5), max_err

    print("KERNEL_OK")
</pallas_src>

<mosaic_0001>
module attributes {stable_mosaic.version = 11 : i64} {
  func.func @kernel(%arg0: i32, %arg1: memref<2x60xi32, #tpu.memory_space<smem>>, %arg2: memref<128x384xi32, #tpu.memory_space<any>>, %arg3: memref<384x128xf32, #tpu.memory_space<vmem>>, %arg4: memref<384x128xf32, #tpu.memory_space<vmem>>, %arg5: memref<1x128xf32, #tpu.memory_space<vmem>>, %arg6: memref<2x128xf32, #tpu.memory_space<vmem>>, %arg7: memref<2x60x384xi32, #tpu.memory_space<vmem>>, %arg8: memref<1x!tpu.dma_semaphore, #tpu.memory_space<semaphore_mem>>) attributes {dimension_semantics = [#tpu.dimension_semantics<parallel>], iteration_bounds = array<i64: 1>, scalar_prefetch = 1 : i64, scratch_operands = 2 : i64, tpu.core_type = #tpu.core_type<tc>, window_params = [{}, {pipeline_mode = #tpu.pipeline_mode<synchronous>, transform_indices = @transform_1, window_bounds = array<i64: 384, 128>}, {pipeline_mode = #tpu.pipeline_mode<synchronous>, transform_indices = @transform_2, window_bounds = array<i64: 384, 128>}, {pipeline_mode = #tpu.pipeline_mode<synchronous>, transform_indices = @transform_3, window_bounds = array<i64: 1, 128>}, {transform_indices = @transform_4, window_bounds = array<i64: 2, 128>}]} {
    %c2_i32 = arith.constant 2 : i32
    %0 = arith.muli %arg0, %c2_i32 : i32
    %c0_i32 = arith.constant 0 : i32
    %c2_i32_0 = arith.constant 2 : i32
    %1 = arith.addi %c0_i32, %c2_i32_0 : i32
    %c1_i32 = arith.constant 1 : i32
    scf.for %arg9 = %c0_i32 to %1 step %c1_i32  : i32 {
      %c1_i32_19 = arith.constant 1 : i32
      %31 = arith.muli %arg9, %c1_i32_19 : i32
      %c0_i32_20 = arith.constant 0 : i32
      %32 = arith.addi %c0_i32_20, %31 : i32
      %c0_i32_21 = arith.constant 0 : i32
      %c60_i32 = arith.constant 60 : i32
      %33 = arith.addi %c0_i32_21, %c60_i32 : i32
      %c1_i32_22 = arith.constant 1 : i32
      scf.for %arg10 = %c0_i32_21 to %33 step %c1_i32_22  : i32 {
        %c1_i32_24 = arith.constant 1 : i32
        %34 = arith.muli %arg10, %c1_i32_24 : i32
        %c0_i32_25 = arith.constant 0 : i32
        %35 = arith.addi %c0_i32_25, %34 : i32
        %36 = arith.addi %0, %32 : i32
        %37 = arith.index_cast %36 : i32 to index
        %38 = arith.index_cast %35 : i32 to index
        %39 = memref.load %arg1[%37, %38] : memref<2x60xi32, #tpu.memory_space<smem>>
        %c0_i32_26 = arith.constant 0 : i32
        %c0_i32_27 = arith.constant 0 : i32
        %40 = tpu.memref_slice %arg2[%39, %c0_i32_27] : memref<128x384xi32, #tpu.memory_space<any>> -> memref<1x384xi32, #tpu.memory_space<any>>
        %41 = tpu.memref_squeeze %40 : memref<1x384xi32, #tpu.memory_space<any>> -> memref<384xi32, #tpu.memory_space<any>>
        %c0_i32_28 = arith.constant 0 : i32
        %42 = tpu.memref_slice %arg7[%32, %35, %c0_i32_28] : memref<2x60x384xi32, #tpu.memory_space<vmem>> -> memref<1x1x384xi32, #tpu.memory_space<vmem>>
        %43 = tpu.memref_squeeze %42 : memref<1x1x384xi32, #tpu.memory_space<vmem>> -> memref<384xi32, #tpu.memory_space<vmem>>
        %44 = tpu.memref_slice %arg8[%c0_i32_26] : memref<1x!tpu.dma_semaphore, #tpu.memory_space<semaphore_mem>> -> memref<1x!tpu.dma_semaphore, #tpu.memory_space<semaphore_mem>>
        %45 = tpu.memref_squeeze %44 : memref<1x!tpu.dma_semaphore, #tpu.memory_space<semaphore_mem>> -> memref<!tpu.dma_semaphore, #tpu.memory_space<semaphore_mem>>
        tpu.enqueue_dma source(%41 : memref<384xi32, #tpu.memory_space<any>>) target(%43 : memref<384xi32, #tpu.memory_space<vmem>>) target_semaphore(%45 : memref<!tpu.dma_semaphore, #tpu.memory_space<semaphore_mem>>)
      }
      %c60_i32_23 = arith.constant 60 : i32
    }
    %c2_i32_1 = arith.constant 2 : i32
    %c0_i32_2 = arith.constant 0 : i32
    %2 = tpu.memref_slice %arg8[%c0_i32_2] : memref<1x!tpu.dma_semaphore, #tpu.memory_space<semaphore_mem>> -> memref<1x!tpu.dma_semaphore, #tpu.memory_space<semaphore_mem>>
    %3 = tpu.memref_squeeze %2 : memref<1x!tpu.dma_semaphore, #tpu.memory_space<semaphore_mem>> -> memref<!tpu.dma_semaphore, #tpu.memory_space<semaphore_mem>>
    tpu.wait_dma2 semaphore(%3 : memref<!tpu.dma_semaphore, #tpu.memory_space<semaphore_mem>>) src(%arg7 : memref<2x60x384xi32, #tpu.memory_space<vmem>>) dst(%arg7 : memref<2x60x384xi32, #tpu.memory_space<vmem>>)
    %c0 = arith.constant 0 : index
    %c0_3 = arith.constant 0 : index
    %c0_4 = arith.constant 0 : index
    %4 = vector.load %arg7[%c0, %c0_3, %c0_4] : memref<2x60x384xi32, #tpu.memory_space<vmem>>, vector<2x60x384xi32>
    %c16_i32 = arith.constant 16 : i32
    %5 = vector.broadcast %c16_i32 : i32 to vector<2x60x384xi32>
    %6 = arith.shli %4, %5 : vector<2x60x384xi32>
    %7 = tpu.bitcast %6 : vector<2x60x384xi32> -> vector<2x60x384xf32>
    %c-65536_i32 = arith.constant -65536 : i32
    %8 = vector.broadcast %c-65536_i32 : i32 to vector<2x60x384xi32>
    %9 = arith.andi %4, %8 : vector<2x60x384xi32>
    %10 = tpu.bitcast %9 : vector<2x60x384xi32> -> vector<2x60x384xf32>
    %cst = arith.constant dense<0.000000e+00> : vector<2x384xf32>
    %11 = vector.multi_reduction <add>, %7, %cst [1] : vector<2x60x384xf32> to vector<2x384xf32>
    %cst_5 = arith.constant 0.0166666675 : f32
    %12 = vector.broadcast %cst_5 : f32 to vector<2x384xf32>
    %13 = arith.mulf %11, %12 : vector<2x384xf32>
    %cst_6 = arith.constant dense<0.000000e+00> : vector<2x384xf32>
    %14 = vector.multi_reduction <add>, %10, %cst_6 [1] : vector<2x60x384xf32> to vector<2x384xf32>
    %cst_7 = arith.constant 0.0166666675 : f32
    %15 = vector.broadcast %cst_7 : f32 to vector<2x384xf32>
    %16 = arith.mulf %14, %15 : vector<2x384xf32>
    %c0_8 = arith.constant 0 : index
    %c0_9 = arith.constant 0 : index
    %17 = vector.load %arg3[%c0_8, %c0_9] : memref<384x128xf32, #tpu.memory_space<vmem>>, vector<384x128xf32>
    %cst_10 = arith.constant dense<0.000000e+00> : vector<2x128xf32>
    %18 = tpu.matmul %13, %17, %cst_10 {dimension_numbers = #tpu.dot_dimension_numbers<[1], [0], [0], [1], [0, 0, 1, 1], [], []>} : vector<2x384xf32>, vector<384x128xf32>, vector<2x128xf32> -> vector<2x128xf32>
    %c0_11 = arith.constant 0 : index
    %c0_12 = arith.constant 0 : index
    %19 = vector.load %arg4[%c0_11, %c0_12] : memref<384x128xf32, #tpu.memory_space<vmem>>, vector<384x128xf32>
    %cst_13 = arith.constant dense<0.000000e+00> : vector<2x128xf32>
    %20 = tpu.matmul %16, %19, %cst_13 {dimension_numbers = #tpu.dot_dimension_numbers<[1], [0], [0], [1], [0, 0, 1, 1], [], []>} : vector<2x384xf32>, vector<384x128xf32>, vector<2x128xf32> -> vector<2x128xf32>
    %21 = arith.addf %18, %20 : vector<2x128xf32>
    %c0_14 = arith.constant 0 : index
    %c0_15 = arith.constant 0 : index
    %22 = vector.load %arg5[%c0_14, %c0_15] : memref<1x128xf32, #tpu.memory_space<vmem>>, vector<1x128xf32>
    %23 = vector.broadcast %22 : vector<1x128xf32> to vector<2x128xf32>
    %24 = arith.addf %21, %23 : vector<2x128xf32>
    %25 = arith.negf %24 : vector<2x128xf32>
    %26 = math.exp %25 : vector<2x128xf32>
    %cst_16 = arith.constant 1.000000e+00 : f32
    %27 = vector.broadcast %cst_16 : f32 to vector<2x128xf32>
    %28 = arith.addf %27, %26 : vector<2x128xf32>
    %29 = arith.divf %27, %28 : vector<2x128xf32>
    %c0_17 = arith.constant 0 : index
    %c0_18 = arith.constant 0 : index
    %30 = vector.load %arg6[%c0_17, %c0_18] : memref<2x128xf32, #tpu.memory_space<vmem>>, vector<2x128xf32>
    tpu.vector_store %arg6[%c0_17, %c0_18], %29 {strides = array<i32>} : memref<2x128xf32, #tpu.memory_space<vmem>>, vector<2x128xf32>,
    return
  }
  func.func @transform_1(%arg0: i32, %arg1: memref<2x60xi32, #tpu.memory_space<smem>>) -> (i32, i32) {
    %c0_i32 = arith.constant 0 : i32
    %c0_i32_0 = arith.constant 0 : i32
    %c0_i32_1 = arith.constant 0 : i32
    return %c0_i32, %c0_i32_0 : i32, i32
  }
  func.func @transform_2(%arg0: i32, %arg1: memref<2x60xi32, #tpu.memory_space<smem>>) -> (i32, i32) {
    %c0_i32 = arith.constant 0 : i32
    %c0_i32_0 = arith.constant 0 : i32
    %c0_i32_1 = arith.constant 0 : i32
    return %c0_i32, %c0_i32_0 : i32, i32
  }
  func.func @transform_3(%arg0: i32, %arg1: memref<2x60xi32, #tpu.memory_space<smem>>) -> (i32, i32) {
    %c0_i32 = arith.constant 0 : i32
    %c0_i32_0 = arith.constant 0 : i32
    %c0_i32_1 = arith.constant 0 : i32
    return %c0_i32, %c0_i32_0 : i32, i32
  }
  func.func @transform_4(%arg0: i32, %arg1: memref<2x60xi32, #tpu.memory_space<smem>>) -> (i32, i32) {
    %c0_i32 = arith.constant 0 : i32
    %c0_i32_0 = arith.constant 0 : i32
    return %arg0, %c0_i32 : i32, i32
  }
}

</mosaic_0001>

<bundles_post_ra>
// kernel: tpu_custom_call.1
= control target key start
LH: loop header
LB: loop body
LE: loop exit
PB: predicated region body
PF: predicated region fallthrough
CT: control target
= control target key end

     0   :  { %s1995_s0 = inlined_call_operand.hbm [shape: s32[2,60], index: 0, kind: input, shape index: {}]   ;;  %s1996_s1 = inlined_call_operand.hbm [shape: u32[128,384], index: 1, kind: input, shape index: {}]   ;;  %s1997_s2 = inlined_call_operand.hbm [shape: f32[384,128], index: 2, kind: input, shape index: {}]   ;;  %s1998_s3 = inlined_call_operand.hbm [shape: f32[384,128], index: 3, kind: input, shape index: {}]   ;;  %s1999_s4 = inlined_call_operand.vmem [shape: f32[1,128], index: 4, kind: input, shape index: {}]   ;;  %s2000_s5 = inlined_call_operand.hbm [shape: f32[2,128], index: 5, kind: output, shape index: {}]  }
   0x1   :  { %s1294_s20 = scalar_lea.hbm %s1995_s0, 32 }
   0x2   :  { %p1295_p0 = scmp.ne.s32.totalorder %s1995_s0, %s1294_s20  ;;  %p1298_p1 = scmp.lt.u32.totalorder %s1294_s20, %s1995_s0 }
   0x4   :  { %p1300_p2 = pnand %p1298_p1, %p1295_p0 }
   0x6   :  { %1303 = shalt.err (!%p1300_p2)  }
   0x7   :  { %s1420_s25 = smov [#allocation5]  }
   0x8   :  { %11 = dma.hbm_to_smem %s1995_s0, 32, %s1420_s25, [#allocation4] }
   0x9   :  { %1402 = dma.done.wait [#allocation4], 32 }
   0xa   :  { %1403 = vsyncadd [#allocation4], 4294967264 }
   0xb   :  { %13 = sfence }
   0xc   :  { %14 = vsyncpa [#allocation7], 0 }
   0xd   :  { %15 = vsyncpa [#allocation10], 0 }
   0xe   :  { %16 = vsyncpa [#allocation8], 0  ;;  %s1421_s28 = smov [#allocation6]   ;;  %s1304_s7 = scalar_lea.hbm %s1997_s2, 6144 }
   0xf   :  { %s22_s29 = sshll.u32 %s1421_s28, 4  ;;  %p1305_p3 = scmp.ne.s32.totalorder %s1997_s2, %s1304_s7  ;;  %s23_s29 = int_to_ptr.vmem [resolvable:$true] %s22_s29 }
  0x10   :  { %p1308_p4 = scmp.lt.u32.totalorder %s1304_s7, %s1997_s2 }
  0x12   :  { %p1310_p5 = pnand %p1308_p4, %p1305_p3 }
  0x14   :  { %1313 = shalt.err (!%p1310_p5)
}
  0x15   :  { %s1314_s0 = scalar_lea.vmem %s23_s29, 6144  ;;  %p1319_p7 = scmp.lt.s32.totalorder %s23_s29, %s23_s29 }
  0x16   :  { %p1315_p6 = scmp.ne.s32.totalorder %s23_s29, %s1314_s0  ;;  %p1320_p8 = scmp.lt.s32.totalorder %s1314_s0, %s1314_s0 }
  0x18   :  { %p1321_p9 = por %p1320_p8, %p1319_p7 }
  0x1a   :  { %p1322_p10 = pnand %p1321_p9, %p1315_p6 }
  0x1c   :  { %1325 = shalt.err (!%p1322_p10)
}
  0x1d   :  { %s1422_s12 = smov 128   ;;  %s1423_s13 = smov 8  }
  0x1e   :  { %28 = dma.hbm_to_vmem [thread:$0]  %s1997_s2, 6144, %s23_s29, [#allocation7], %s1422_s12, %s1422_s12, %s1423_s13  }
  0x1f   :  { %s1424_s16 = smov [#allocation9]   ;;  %s1326_s20 = scalar_lea.hbm %s1998_s3, 6144 }
  0x20   :  { %s34_s17 = sshll.u32 %s1424_s16, 4  ;;  %p1327_p11 = scmp.ne.s32.totalorder %s1998_s3, %s1326_s20  ;;  %s35_s17 = int_to_ptr.vmem [resolvable:$true] %s34_s17 }
  0x21   :  { %p1330_p12 = scmp.lt.u32.totalorder %s1326_s20, %s1998_s3 }
  0x23   :  { %p1332_p13 = pnand %p1330_p12, %p1327_p11 }
  0x25   :  { %1335 = shalt.err (!%p1332_p13)
}
  0x26   :  { %s1336_s25 = scalar_lea.vmem %s35_s17, 6144  ;;  %p1341_p1 = scmp.lt.s32.totalorder %s35_s17, %s35_s17 }
  0x27   :  { %p1337_p0 = scmp.ne.s32.totalorder %s35_s17, %s1336_s25  ;;  %p1342_p2 = scmp.lt.s32.totalorder %s1336_s25, %s1336_s25 }
  0x29   :  { %p1343_p3 = por %p1342_p2, %p1341_p1 }
  0x2b   :  { %p1344_p4 = pnand %p1343_p3, %p1337_p0 }
  0x2d   :  { %1347 = shalt.err (!%p1344_p4)
}
  0x2e   :  { %40 = dma.hbm_to_vmem [thread:$0]  %s1998_s3, 6144, %s35_s17, [#allocation10], %s1422_s12, %s1422_s12, %s1423_s13  }
  0x2f   :  { %1404 = dma.done.wait [#allocation7], 6144  }
  0x30   :  { %1405 = vsyncadd [#allocation7], 4294961152 }
  0x31   :  { %1406 = dma.done.wait [#allocation10], 6144  }
  0x32   :  { %1407 = vsyncadd [#allocation10], 4294961152  ;;  %s1498_s27 = smov 0  }
  0x33 LB: > { %s1503_s28 = smov 0   ;;  %s1414_s27 = sphi %s1498_s27, %s55_s27  }
  0x34 LB: >> { %s81_s3 = smul.u32 192, %s1414_s27  ;;  %s63_s29 = sshra.s32 %s1418_s28, 7  ;;  %s1418_s28 = sphi %s1503_s28, %s61_s28  }
  0x35   : >> { %s68_s30 = sand.u32 127, %s1418_s28  ;;  %s65_s6 = sadd.s32 %s1414_s27, %s63_s29 }
  0x36   : >> { %s77_s7 = sshrl.u32 %s1418_s28, 3  ;;  %s972_s8 = sshll.u32 %s65_s6, 7 }
  0x37   : >> { %s78_s9 = sand.u32 7, %s1418_s28   ;;  %s69_s10 = sadd.s32 %s972_s8, %s68_s30 }
  0x38   : >> { %s79_s11 = smul.u32 24, %s77_s7  ;;  %s70_s0 = sld [smem:[#allocation5 + %s69_s10]] }
  0x39   : >> { %s1350_s26 = scalar_lea.hbm %s1996_s1, 6144 }
  0x3a   : >> { %s80_s12 = sadd.s32 %s79_s11, %s78_s9 }
  0x3b   : >> { %s82_s13 = sadd.s32 %s81_s3, %s80_s12 }
  0x3c   : >> { %s83_s14 = scalar_lea.vmem [#allocation2], %s82_s13 }
  0x3d   : >> { %s85_s15 = sshll.u32 %s83_s14, 4  ;;  %s1514_s15 = int_to_ptr.vmem [resolvable:$true] %s85_s15 }
  0x3e   : >> { %s71_s16 = sshrl.u32 %s70_s0, 3  ;;  %s72_s17 = sand.u32 7, %s70_s0  }
  0x3f   : >> { %s73_s18 = smul.u32 24, %s71_s16 }
  0x41   : >> { %s74_s19 = sadd.s32 %s73_s18, %s72_s17 }
  0x42   : >> { %s973_s20 = sshll.u32 %s74_s19, 4 }
  0x43   : >> { %s76_s23 = scalar_lea.hbm %s1996_s1, %s973_s20 }
  0x44   : >> { %s1348_s24 = scalar_lea.hbm %s76_s23, 48  ;;  %p1351_p6 = scmp.lt.u32.totalorder %s76_s23, %s1996_s1 }
  0x45   : >> { %p1349_p5 = scmp.ne.s32.totalorder %s76_s23, %s1348_s24  ;;  %p1352_p7 = scmp.lt.u32.totalorder %s1350_s26, %s1348_s24 }
  0x46   : >> { %p1354_p9 = scmp.lt.u32.totalorder %s1348_s24, %s76_s23 }
  0x47   : >> { %p1353_p8 = por %p1352_p7, %p1351_p6 }
  0x49   : >> { %p1355_p10 = por %p1354_p9, %p1353_p8 }
  0x4b   : >> { %p1356_p11 = pnand %p1355_p10, %p1349_p5 }
  0x4d   : >> { %1359 = shalt.err (!%p1356_p11)  }
  0x4e   : >> { %s1360_s30 = scalar_lea.vmem %s1514_s15, 48  ;;  %s1425_s6 = smov [#allocation2]  }
  0x4f   : >> { %p1361_p12 = scmp.ne.s32.totalorder %s1514_s15, %s1360_s30  ;;  %s1362_s7 = sshll.u32 %s1425_s6, 4  ;;  %s1363_s7 = int_to_ptr.vmem [resolvable:$false] %s1362_s7 }
  0x50   : >> { %s1364_s8 = scalar_lea.vmem %s1363_s7, 6144  ;;  %p1365_p13 = scmp.lt.s32.totalorder %s1514_s15, %s1363_s7 }
  0x51   : >> { %p1366_p0 = scmp.lt.s32.totalorder %s1364_s8, %s1360_s30 }
  0x53   : >> { %p1367_p1 = por %p1366_p0, %p1365_p13 }
  0x55   : >> { %p1368_p2 = pnand %p1367_p1, %p1361_p12 }
  0x57   : >> { %1371 = shalt.err (!%p1368_p2)  }
  0x58   : >> { %s1426_s9 = smov 128   ;;  %s1427_s10 = smov 1  }
  0x59   : >> { %88 = dma.hbm_to_vmem [thread:$0]  %s76_s23, 48, %s1514_s15, [#allocation3], %s1426_s9, %s1426_s9, %s1427_s10 }
  0x5a   : >> { %s61_s28 = sadd.s32 1, %s1418_s28  }
  0x5b   : >> { %p58_p3 = scmp.ge.s32.totalorder %s61_s28, 60  }
  0x5c   : > { %s55_s27 = sadd.s32 (%p58_p3), 1, %s1414_s27  }
  0x5d   : > { %60 = sbr.rel (!%p58_p3) target bundleno = 52 (0x34), region = 56  ;;  %p52_p4 = scmp.ge.s32.totalorder (%p58_p3), %s55_s27, 2  }
  0x64   :  { %54 = sbr.rel (!%p52_p4) target bundleno = 51 (0x33), region = 67 }
  0x6b   :  { %1408 = dma.done.wait [#allocation3], 6144 }
  0x6c   :  { %1409 = vsyncadd [#allocation3], 4294961152  ;;  %v2001_v0 = vmov 0.0|0.0   ;;  %vm1429_vm0 = vmmov 0   ;;  %v2003_v1 = vmov 0.0   ;;  %v579_v2 = vld [vmem:[#allocation9 + $0x80] sm:$0xff] }
  0x6d   :  { %1183 = vmatprep.subr.bf16.mxu1 %v2001_v0  ;;  %1113 = vmatprep.mubr.msk.f32.mxu1 %vm1429_vm0, %v2003_v1  ;;  %v580_v3 = vld [vmem:[#allocation9 + $0x88] sm:$0xff]  ;;  %v563_v4 = vld [vmem:[#allocation9] sm:$0xff]  ;;  %v581_v7 = vld [vmem:[#allocation9 + $0x90] sm:$0xff]  ;;  %vm340_vm1 = vcmask 1043456   ;;  %vm617_vm2 = vcmask 1041409   ;;  %s1431_s28 = smov [#allocation11]  }
  0x6e   :  { %v1151_v5 = vpack.c.bf16 %v580_v3, %v579_v2  ;;  %v564_v6 = vld [vmem:[#allocation9 + $0x8] sm:$0xff]  ;;  %v582_v8 = vld [vmem:[#allocation9 + $0x98] sm:$0xff]  ;;  %v595_v11 = vld [vmem:[#allocation9 + $0x100] sm:$0xff]  ;;  %s937_s11 = sshll.u32 %s1431_s28, 4  ;;  %s938_s11 = int_to_ptr.vmem [resolvable:$true] %s937_s11 }
  0x6f   :  { %v1153_v9 = vpack.c.bf16 %v564_v6, %v563_v4  ;;  %v1155_v10 = vpack.c.bf16 %v582_v8, %v581_v7  ;;  %v596_v12 = vld [vmem:[#allocation9 + $0x108] sm:$0xff]  ;;  %v565_v13 = vld [vmem:[#allocation9 + $0x10] sm:$0xff]  ;;  %v566_v15 = vld [vmem:[#allocation9 + $0x18] sm:$0xff]  ;;  %s1372_s0 = scalar_lea.vmem %s938_s11, 32  ;;  %p1377_p6 = scmp.lt.s32.totalorder %s938_s11, %s938_s11 }
  0x70   :  { %1152 = vmatprep.subr.bf16.mxu0 %v1151_v5  ;;  %v1184_v14 = vpack.c.bf16 %v596_v12, %v595_v11  ;;  %v583_v16 = vld [vmem:[#allocation9 + $0xa0] sm:$0xff]  ;;  %v584_v17 = vld [vmem:[#allocation9 + $0xa8] sm:$0xff]  ;;  %v1157_v18 = vpack.c.bf16 %v566_v15, %v565_v13  ;;  %v597_v19 = vld [vmem:[#allocation9 + $0x110] sm:$0xff]  ;;  %p1373_p5 = scmp.ne.s32.totalorder %s938_s11, %s1372_s0  ;;  %p1378_p7 = scmp.lt.s32.totalorder %s1372_s0, %s1372_s0 }
  0x71   :  { %1154 = vmatpush3.bf16.msra.mxu0 %v1153_v9  ;;  %v598_v20 = vld [vmem:[#allocation9 + $0x118] sm:$0xff]  ;;  %v1159_v21 = vpack.c.bf16 %v584_v17, %v583_v16  ;;  %v567_v23 = vld [vmem:[#allocation9 + $0x20] sm:$0xff]  ;;  %v568_v24 = vld [vmem:[#allocation9 + $0x28] sm:$0xff] }
  0x72   :  { %1156 = vmatprep.subr.bf16.mxu0 %v1155_v10  ;;  %1185 = vmatpush3.bf16.msra.mxu1 %v1184_v14  ;;  %v1187_v22 = vpack.c.bf16 %v598_v20, %v597_v19  ;;  %v585_v25 = vld [vmem:[#allocation9 + $0xb0] sm:$0xff]  ;;  %v586_v26 = vld [vmem:[#allocation9 + $0xb8] sm:$0xff]  ;;  %v599_v27 = vld [vmem:[#allocation9 + $0x120] sm:$0xff]  ;;  %v1161_v29 = vpack.c.bf16 %v568_v24, %v567_v23  ;;  %p1379_p8 = por %p1378_p7, %p1377_p6 }
  0x73   :  { %1186 = vmatprep.subr.bf16.mxu1 %v2001_v0  ;;  %v600_v28 = vld [vmem:[#allocation9 + $0x128] sm:$0xff]  ;;  %v1163_v30 = vpack.c.bf16 %v586_v26, %v585_v25  ;;  %v569_v32 = vld [vmem:[#allocation9 + $0x30] sm:$0xff]  ;;  %v570_v33 = vld [vmem:[#allocation9 + $0x38] sm:$0xff] }
  0x74   :  { %v1190_v31 = vpack.c.bf16 %v600_v28, %v599_v27  ;;  %v587_v34 = vld [vmem:[#allocation9 + $0xc0] sm:$0xff]  ;;  %v588_v35 = vld [vmem:[#allocation9 + $0xc8] sm:$0xff]  ;;  %v601_v36 = vld [vmem:[#allocation9 + $0x130] sm:$0xff]  ;;  %v1165_v38 = vpack.c.bf16 %v570_v33, %v569_v32  ;;  %p1380_p9 = pnand %p1379_p8, %p1373_p5 }
  0x75   :  { %1158 = vmatpush3.bf16.msra.mxu0 %v1157_v18  ;;  %v602_v37 = vld [vmem:[#allocation9 + $0x138] sm:$0xff]  ;;  %v571_v39 = vld [vmem:[#allocation9 + $0x40] sm:$0xff]  ;;  %v572_v40 = vld [vmem:[#allocation9 + $0x48] sm:$0xff]  ;;  %v1167_v42 = vpack.c.bf16 %v588_v35, %v587_v34 }
  0x76   :  { %1160 = vmatprep.subr.bf16.mxu0 %v1159_v21  ;;  %1188 = vmatpush3.bf16.msra.mxu1 %v1187_v22  ;;  %v589_v41 = vld [vmem:[#allocation9 + $0xd0] sm:$0xff]  ;;  %v1193_v43 = vpack.c.bf16 %v602_v37, %v601_v36  ;;  %v590_v44 = vld [vmem:[#allocation9 + $0xd8] sm:$0xff]  ;;  %v603_v45 = vld [vmem:[#allocation9 + $0x140] sm:$0xff]  ;;  %v1169_v53 = vpack.c.bf16 %v572_v40, %v571_v39 }
  0x77   :  { %1189 = vmatprep.subr.bf16.mxu1 %v2001_v0  ;;  %v604_v46 = vld [vmem:[#allocation9 + $0x148] sm:$0xff]  ;;  %v1541_v47 = vld [vmem:[#allocation9 + $0x50] sm:$0xff]  ;;  %v1543_v48 = vld [vmem:[#allocation9 + $0x58] sm:$0xff]  ;;  %v1171_v62 = vpack.c.bf16 %v590_v44, %v589_v41 }
  0x78   :  { %v1545_v49 = vld [vmem:[#allocation9 + $0xe0] sm:$0xff]  ;;  %v1547_v50 = vld [vmem:[#allocation9 + $0xe8] sm:$0xff]  ;;  %v1553_v54 = vld [vmem:[#allocation9 + $0x150] sm:$0xff]  ;;  %v1196_v63 = vpack.c.bf16 %v604_v46, %v603_v45  ;;  %v1173_v13 = vpack.c.bf16 %v1543_v48, %v1541_v47 }
  0x79   :  { %1162 = vmatpush3.bf16.msra.mxu0 %v1161_v29  ;;  %v1549_v51 = vld [vmem:[#allocation2 + $0x8] sm:$0xff]  ;;  %v1551_v52 = vld [vmem:[#allocation2 + $0x20] sm:$0xff]  ;;  %v1555_v55 = vld [vmem:[#allocation9 + $0x158] sm:$0xff]  ;;  %v1175_v14 = vpack.c.bf16 %v1547_v50, %v1545_v49 }
  0x7a   :  { %1164 = vmatprep.subr.bf16.mxu0 %v1163_v30  ;;  %1191 = vmatpush3.bf16.msra.mxu1 %v1190_v31  ;;  %v1557_v56 = vld [vmem:[#allocation9 + $0x60] sm:$0xff]  ;;  %v1559_v57 = vld [vmem:[#allocation9 + $0x68] sm:$0xff]  ;;  %v1561_v58 = vld [vmem:[#allocation2 + $0x38] sm:$0xff]  ;;  %v239_v60 = vand.u32 4294901760, %v1549_v51  ;;  %v242_v61 = vand.u32 4294901760, %v1551_v52  ;;  %v1199_v27 = vpack.c.bf16 %v1555_v55, %v1553_v54 }
  0x7b   :  { %1192 = vmatprep.subr.bf16.mxu1 %v2001_v0  ;;  %v1563_v59 = vld [vmem:[#allocation2 + $0x50] sm:$0xff]  ;;  %v1567_v2 = vld [vmem:[#allocation2 + $0x68] sm:$0xff]  ;;  %v1569_v3 = vld [vmem:[#allocation2 + $0x80] sm:$0xff]  ;;  %v245_v5 = vand.u32 4294901760, %v1561_v58  ;;  %v1177_v28 = vpack.c.bf16 %v1559_v57, %v1557_v56 }
  0x7c   :  { %v1571_v4 = vld [vmem:[#allocation2 + $0xb0] sm:$0xf]  ;;  %v1577_v7 = vld [vmem:[#allocation9 + $0xf8] sm:$0xff]  ;;  %v1579_v8 = vld [vmem:[#allocation2 + $0xc8] sm:$0xff]  ;;  %v248_v11 = vand.u32 4294901760, %v1563_v59  ;;  %v439_v12 = vadd.f32 %v242_v61, %v239_v60  ;;  %v251_v23 = vand.u32 4294901760, %v1567_v2 }
  0x7d   :  { %1166 = vmatpush3.bf16.msra.mxu0 %v1165_v38  ;;  %v1575_v6 = vld [vmem:[#allocation9 + $0xf0] sm:$0xff]  ;;  %v1581_v9 = vld [vmem:[#allocation2 + $0xe0] sm:$0xff]  ;;  %v1583_v10 = vld [vmem:[#allocation2 + $0xf8] sm:$0xff]  ;;  %v263_v18 = vand.u32 4294901760, %v1579_v8  ;;  %v254_v24 = vand.u32 4294901760, %v1569_v3  ;;  %v260_v30 = vand.u32 4294901760, %v1571_v4 }
  0x7e   :  { %1168 = vmatprep.subr.bf16.mxu0 %v1167_v42  ;;  %1194 = vmatpush3.bf16.msra.mxu1 %v1193_v43  ;;  %v1590_v15 = vld [vmem:[#allocation9 + $0x160] sm:$0xff]  ;;  %v1592_v16 = vld [vmem:[#allocation9 + $0x168] sm:$0xff]  ;;  %v1594_v17 = vld [vmem:[#allocation2 + $0x110] sm:$0xff]  ;;  %v266_v19 = vand.u32 4294901760, %v1581_v9  ;;  %v269_v25 = vand.u32 4294901760, %v1583_v10  ;;  %v440_v26 = vadd.f32 %v439_v12, %v245_v5  ;;  %v1179_v40 = vpack.c.bf16 %v1577_v7, %v1575_v6 }
  0x7f   :  { %1195 = vmatprep.subr.bf16.mxu1 %v2001_v0  ;;  %v1598_v20 = vld [vmem:[#allocation2 + $0x98] sm:$0xff]  ;;  %v1600_v21 = vld [vmem:[#allocation2 + $0x128] sm:$0xff]  ;;  %v1602_v22 = vld [vmem:[#allocation2 + $0x140] sm:$0xff]  ;;  %v272_v31 = vand.u32 4294901760, %v1594_v17  ;;  %v1202_v41 = vpack.c.bf16 %v1592_v16, %v1590_v15  ;;  %v445_v57 = vsel %vm340_vm1, %v260_v30, 0.0 }
  0x80   :  { %v1611_v29 = vld [vmem:[#allocation2 + $0x170] sm:$0xf]  ;;  %v1615_v32 = vld [vmem:[#allocation2] sm:$0xff]  ;;  %v1617_v33 = vld [vmem:[#allocation2 + $0x18] sm:$0xff]  ;;  %v441_v35 = vadd.f32 %v440_v26, %v248_v11  ;;  %v481_v36 = vadd.f32 %v266_v19, %v263_v18  ;;  %v257_v44 = vand.u32 4294901760, %v1598_v20  ;;  %v275_v45 = vand.u32 4294901760, %v1600_v21 }
  0x81   :  { %1170 = vmatpush3.bf16.msra.mxu0 %v1169_v53  ;;  %v1620_v34 = vld [vmem:[#allocation2 + $0x158] sm:$0xff]  ;;  %v1622_v37 = vld [vmem:[#allocation2 + $0x30] sm:$0xff]  ;;  %v238_v38 = vand.u32 4294901760, %v1615_v32  ;;  %v241_v39 = vand.u32 4294901760, %v1617_v33  ;;  %v1632_v46 = vld [vmem:[#allocation2 + $0x48] sm:$0xff]  ;;  %v278_v47 = vand.u32 4294901760, %v1602_v22 }
  0x82   :  { %1172 = vmatprep.subr.bf16.mxu0 %v1171_v62  ;;  %1197 = vmatpush3.bf16.msra.mxu1 %v1196_v63  ;;  %v577_v42 = vld [vmem:[#allocation9 + $0x70] sm:$0xff]  ;;  %v578_v43 = vld [vmem:[#allocation9 + $0x78] sm:$0xff]  ;;  %2041 = vst [vmem:[#allocation18_spill] sm:$0xff] %v1632_v46  ;;  %v284_v48 = vand.u32 4294901760, %v1611_v29  ;;  %v442_v49 = vadd.f32 %v441_v35, %v251_v23  ;;  %v482_v50 = vadd.f32 %v481_v36, %v269_v25  ;;  %v1636_v53 = vld [vmem:[#allocation2 + $0xc0] sm:$0xff]  ;;  %v281_v56 = vand.u32 4294901760, %v1620_v34 }
  0x83   :  { %1198 = vmatprep.subr.bf16.mxu1 %v2001_v0  ;;  %v1638_v54 = vld [vmem:[#allocation2 + $0xd8] sm:$0xff]  ;;  %v1640_v55 = vld [vmem:[#allocation2 + $0xf0] sm:$0xff]  ;;  %v1644_v60 = vld [vmem:[#allocation2 + $0x60] sm:$0xff]  ;;  %v244_v61 = vand.u32 4294901760, %v1622_v37  ;;  %v425_v62 = vadd.f32 %v241_v39, %v238_v38  ;;  %v262_v7 = vand.u32 4294901760, %v1636_v53  ;;  %v247_v15 = vand.u32 4294901760, %v1632_v46 }
  0x84   :  { %2042 = vst [vmem:[#allocation19_spill] sm:$0xff] %v1640_v55  ;;  %2043 = vst [vmem:[#allocation20_spill] sm:$0xff] %v1644_v60  ;;  %v443_v63 = vadd.f32 %v442_v49, %v254_v24  ;;  %v483_v5 = vadd.f32 %v482_v50, %v272_v31  ;;  %v1648_v6 = vld [vmem:[#allocation2 + $0x108] sm:$0xff]  ;;  %v265_v11 = vand.u32 4294901760, %v1638_v54  ;;  %v609_v12 = vld [vmem:[#allocation9 + $0x170] sm:$0xff]  ;;  %v268_v16 = vand.u32 4294901760, %v1640_v55 }
  0x85   :  { %1174 = vmatpush3.bf16.msra.mxu0 %v1173_v13  ;;  %2044 = vst [vmem:[#allocation21_spill] sm:$0xff] %v1648_v6  ;;  %v1181_v13 = vpack.c.bf16 %v578_v43, %v577_v42  ;;  %v610_v18 = vld [vmem:[#allocation9 + $0x178] sm:$0xff]  ;;  %v531_v19 = vld [vmem:[#allocation6 + $0x80] sm:$0xff]  ;;  %v487_v25 = vsel %vm340_vm1, %v284_v48, 0.0  ;;  %v250_v30 = vand.u32 4294901760, %v1644_v60  ;;  %v532_v31 = vld [vmem:[#allocation6 + $0x88] sm:$0xff]  ;;  %v426_v38 = vadd.f32 %v425_v62, %v244_v61 }
  0x86   :  { %1176 = vmatprep.subr.bf16.mxu0 %v1175_v14  ;;  %1200 = vmatpush3.bf16.msra.mxu1 %v1199_v27  ;;  %v1652_v14 = vld [vmem:[#allocation2 + $0xa8] sm:$0xf]  ;;  %v444_v23 = vadd.f32 %v443_v63, %v257_v44  ;;  %v484_v24 = vadd.f32 %v483_v5, %v275_v45  ;;  %v1657_v26 = vld [vmem:[#allocation2 + $0x78] sm:$0xff]  ;;  %v1659_v27 = vld [vmem:[#allocation2 + $0x120] sm:$0xff]  ;;  %v271_v36 = vand.u32 4294901760, %v1648_v6  ;;  %v467_v39 = vadd.f32 %v265_v11, %v262_v7 }
  0x87   :  { %1201 = vmatprep.subr.bf16.mxu1 %v2001_v0  ;;  %2045 = vst [vmem:[#allocation22_spill] sm:$0xff] %v1652_v14  ;;  %2046 = vst [vmem:[#allocation23_spill] sm:$0xff] %v1657_v26  ;;  %v1662_v35 = vld [vmem:[#allocation2 + $0x90] sm:$0xff]  ;;  %v1666_v44 = vld [vmem:[#allocation2 + $0x138] sm:$0xff]  ;;  %v259_v48 = vand.u32 4294901760, %v1652_v14  ;;  %v1207_v49 = vpack.c.bf16 %v532_v31, %v531_v19  ;;  %v274_v50 = vand.u32 4294901760, %v1659_v27  ;;  %v427_v61 = vadd.f32 %v426_v38, %v247_v15 }
  0x88   :  { %2047 = vst [vmem:[#allocation24_spill] sm:$0xff] %v1659_v27  ;;  %2048 = vst [vmem:[#allocation25_spill] sm:$0xff] %v1662_v35  ;;  %v446_v42 = vadd.f32 %v445_v57, %v444_v23  ;;  %v485_v43 = vadd.f32 %v484_v24, %v278_v47  ;;  %v1668_v45 = vld [vmem:[#allocation2 + $0x168] sm:$0xf]  ;;  %v468_v62 = vadd.f32 %v467_v39, %v268_v16  ;;  %v256_v63 = vand.u32 4294901760, %v1662_v35  ;;  %v1676_v5 = vld [vmem:[#allocation2 + $0x10] sm:$0xff] }
  0x89   :  { %1178 = vmatpush3.bf16.msra.mxu0 %v1177_v28  ;;  %v1205_v28 = vpack.c.bf16 %v610_v18, %v609_v12  ;;  %2049 = vst [vmem:[#allocation26_spill] sm:$0xff] %v1666_v44  ;;  %2050 = vst [vmem:[#allocation27_spill] sm:$0xff] %v1668_v45  ;;  %v1678_v7 = vld [vmem:[#allocation2 + $0x28] sm:$0xff]  ;;  %v277_v11 = vand.u32 4294901760, %v1666_v44  ;;  %v283_v12 = vand.u32 4294901760, %v1668_v45  ;;  %v428_v18 = vadd.f32 %v427_v61, %v250_v30  ;;  %v1682_v23 = vld [vmem:[#allocation2 + $0xd0] sm:$0xff] }
  0x8a   :  { %1180 = vmatprep.subr.bf16.mxu0 %v1179_v40  ;;  %1203 = vmatpush3.bf16.msra.mxu1 %v1202_v41  ;;  %v1671_v40 = vld [vmem:[#allocation2 + $0x150] sm:$0xff]  ;;  %v253_v41 = vand.u32 4294901760, %v1657_v26  ;;  %v447_v57 = vrot.slane %v446_v42, 4  ;;  %v486_v47 = vadd.f32 %v485_v43, %v281_v56  ;;  %2052 = vst [vmem:[#allocation29_spill] sm:$0xff] %v1676_v5  ;;  %2053 = vst [vmem:[#allocation30_spill] sm:$0xff] %v1678_v7  ;;  %v1684_v15 = vld [vmem:[#allocation2 + $0xe8] sm:$0xff] }
  0x8b   :  { %1204 = vmatprep.subr.bf16.mxu1 %v2001_v0  ;;  %2051 = vst [vmem:[#allocation28_spill] sm:$0xff] %v1671_v40  ;;  %v469_v19 = vadd.f32 %v468_v62, %v271_v36  ;;  %2054 = vst [vmem:[#allocation31_spill] sm:$0xff] %v1682_v23  ;;  %v280_v16 = vand.u32 4294901760, %v1671_v40  ;;  %v431_v24 = vsel %vm340_vm1, %v259_v48, 0.0  ;;  %v1688_v31 = vld [vmem:[#allocation2 + $0x40] sm:$0xff]  ;;  %v1691_v30 = vld [vmem:[#allocation2 + $0x58] sm:$0xff] }
  0x8c   :  { %2055 = vst [vmem:[#allocation32_spill] sm:$0xff] %v1684_v15  ;;  %v488_v56 = vadd.f32 %v487_v25, %v486_v47  ;;  %2056 = vst [vmem:[#allocation33_spill] sm:$0xff] %v1688_v31  ;;  %v429_v38 = vadd.f32 %v428_v18, %v253_v41  ;;  %v1693_v36 = vld [vmem:[#allocation2 + $0x100] sm:$0xff]  ;;  %v243_v43 = vand.u32 4294901760, %v1678_v7  ;;  %v264_v48 = vand.u32 4294901760, %v1682_v23  ;;  %v1728_v44 = vld [vmem:[#allocation6 + $0x8] sm:$0xff] }
  0x8d   :  { %1182 = vmatpush3.bf16.msra.mxu0 %v1181_v13  ;;  %v448_v13 = vadd.f32 %v447_v57, %v446_v42  ;;  %v470_v39 = vadd.f32 %v469_v19, %v274_v50  ;;  %2057 = vst [vmem:[#allocation34_spill] sm:$0xff] %v1691_v30  ;;  %2058 = vst [vmem:[#allocation35_spill] sm:$0xff] %v1693_v36  ;;  %v267_v61 = vand.u32 4294901760, %v1684_v15  ;;  %v473_v41 = vsel %vm340_vm1, %v283_v12, 0.0  ;;  %v1702_v50 = vld [vmem:[#allocation2 + $0x118] sm:$0xff]  ;;  %v1709_v15 = vld [vmem:[#allocation2 + $0x130] sm:$0xff] }
  0x8e   :  { %1206 = vmatpush3.bf16.msra.mxu1 %v1205_v28  ;;  %1208 = vmatprep.subr.bf16.mxu0 %v1207_v49  ;;  %v240_v28 = vand.u32 4294901760, %v1676_v5  ;;  %v489_v25 = vrot.slane %v488_v56, 4  ;;  %v1697_v49 = vld [vmem:[#allocation2 + $0x70] sm:$0xff]  ;;  %v430_v62 = vadd.f32 %v429_v38, %v256_v63  ;;  %2060 = vst [vmem:[#allocation37_spill] sm:$0xff] %v1702_v50  ;;  %v246_v47 = vand.u32 4294901760, %v1688_v31  ;;  %2062 = vst [vmem:[#allocation39_spill] sm:$0xff] %v1709_v15 }
  0x8f   :  { %1239 = vmatprep.subr.bf16.mxu1 %v2001_v0  ;;  %v449_v42 = vrot.slane %v448_v13, 2  ;;  %2059 = vst [vmem:[#allocation36_spill] sm:$0xff] %v1697_v49  ;;  %v471_v57 = vadd.f32 %v470_v39, %v277_v11  ;;  %v1705_v0 = vld [vmem:[#allocation2 + $0x88] sm:$0xff]  ;;  %v249_v1 = vand.u32 4294901760, %v1691_v30  ;;  %v270_v7 = vand.u32 4294901760, %v1693_v36  ;;  %v1712_v39 = vld [vmem:[#allocation2 + $0xa0] sm:$0xff] }
  0x90   :  { %v490_v19 = vadd.f32 %v489_v25, %v488_v56  ;;  %2061 = vst [vmem:[#allocation38_spill] sm:$0xff] %v1705_v0  ;;  %v432_v23 = vadd.f32 %v431_v24, %v430_v62  ;;  %v252_v63 = vand.u32 4294901760, %v1697_v49  ;;  %v453_v11 = vadd.f32 %v243_v43, %v240_v28  ;;  %2063 = vst [vmem:[#allocation40_spill] sm:$0xff] %v1712_v39  ;;  %v1715_v30 = vld [vmem:[#allocation2 + $0xb8] sm:$0xf]  ;;  %v1717_v36 = vld [vmem:[#allocation2 + $0x148] sm:$0xff] }
  0x91   :  { %v450_v18 = vadd.f32 %v449_v42, %v448_v13  ;;  %v472_v5 = vadd.f32 %v471_v57, %v280_v16  ;;  %v273_v13 = vand.u32 4294901760, %v1702_v50  ;;  %v495_v56 = vadd.f32 %v267_v61, %v264_v48  ;;  %2064 = vst [vmem:[#allocation41_spill] sm:$0xff] %v1715_v30  ;;  %2065 = vst [vmem:[#allocation42_spill] sm:$0xff] %v1717_v36  ;;  %v1720_v49 = vld [vmem:[#allocation2 + $0x178] sm:$0xf]  ;;  %v1723_v50 = vld [vmem:[#allocation2 + $0x160] sm:$0xff] }
  0x92   :  { %v491_v38 = vrot.slane %v490_v19, 2  ;;  %v433_v42 = vrot.slane %v432_v23, 4  ;;  %v255_v16 = vand.u32 4294901760, %v1705_v0  ;;  %v454_v24 = vadd.f32 %v453_v11, %v246_v47  ;;  %2066 = vst [vmem:[#allocation43_spill] sm:$0xff] %v1720_v49  ;;  %2067 = vst [vmem:[#allocation44_spill] sm:$0xff] %v1723_v50  ;;  %v1767_v45 = vld [vmem:[#allocation6 + $0x30] sm:$0xff] }
  0x93   :  { %v451_v12 = vrot.slane %v450_v18, 1  ;;  %v474_v25 = vadd.f32 %v473_v41, %v472_v5  ;;  %v276_v28 = vand.u32 4294901760, %v1709_v15  ;;  %v496_v43 = vadd.f32 %v495_v56, %v270_v7  ;;  %v1726_v41 = vld [vmem:[#allocation6] sm:$0xff]  ;;  %v1735_v56 = vld [vmem:[#allocation6 + $0x98] sm:$0xff] }
  0x94   :  { %v492_v57 = vadd.f32 %v491_v38, %v490_v19  ;;  %v434_v31 = vadd.f32 %v433_v42, %v432_v23  ;;  %v258_v5 = vand.u32 4294901760, %v1712_v39  ;;  %v455_v48 = vadd.f32 %v454_v24, %v249_v1  ;;  %v1733_v38 = vld [vmem:[#allocation6 + $0x90] sm:$0xff]  ;;  %v1828_v46 = vld [vmem:[#allocation6 + $0x60] sm:$0xff] }
  0x95   :  { %v452_v62 = vadd.f32 %v451_v12, %v450_v18  ;;  %v475_v40 = vrot.slane %v474_v25, 4  ;;  %v261_v47 = vand.u32 4294901760, %v1715_v30  ;;  %v279_v18 = vand.u32 4294901760, %v1717_v36  ;;  %v1737_v1 = vld [vmem:[#allocation6 + $0x10] sm:$0xff]  ;;  %v1740_v30 = vld [vmem:[#allocation6 + $0x18] sm:$0xff]  ;;  %v1742_v36 = vld [vmem:[#allocation6 + $0x100] sm:$0xff] }
  0x96   :  { %v493_v61 = vrot.slane %v492_v57, 1  ;;  %v497_v19 = vadd.f32 %v496_v43, %v273_v13  ;;  %v435_v11 = vrot.slane %v434_v31, 2  ;;  %v285_v7 = vand.u32 4294901760, %v1720_v49  ;;  %2068 = vst [vmem:[#allocation45_spill] sm:$0xff] %v1742_v36  ;;  %v1744_v13 = vld [vmem:[#allocation6 + $0x108] sm:$0xff]  ;;  %v1746_v43 = vld [vmem:[#allocation6 + $0xa0] sm:$0xff] }
  0x97   :  { %v476_v12 = vadd.f32 %v475_v40, %v474_v25  ;;  %v456_v23 = vadd.f32 %v455_v48, %v252_v63  ;;  %v510_v24 = vmul.f32 0.016666668, %v452_v62  ;;  %v282_v15 = vand.u32 4294901760, %v1723_v50  ;;  %2069 = vst [vmem:[#allocation46_spill] sm:$0xff] %v1744_v13  ;;  %v1748_v48 = vld [vmem:[#allocation6 + $0xa8] sm:$0xff]  ;;  %v1750_v49 = vld [vmem:[#allocation6 + $0x20] sm:$0xff] }
  0x98   :  { %v494_v42 = vadd.f32 %v493_v61, %v492_v57  ;;  %v498_v39 = vadd.f32 %v497_v19, %v276_v28  ;;  %v436_v40 = vadd.f32 %v435_v11, %v434_v31  ;;  %v1752_v57 = vld [vmem:[#allocation6 + $0x28] sm:$0xff]  ;;  %v1754_v62 = vld [vmem:[#allocation6 + $0x110] sm:$0xff]  ;;  %v459_v31 = vsel %vm340_vm1, %v261_v47, 0.0  ;;  %v1764_v50 = vld [vmem:[#allocation6 + $0xb8] sm:$0xff]  ;;  %2077 = vst [vmem:[#allocation54_spill] sm:$0xff] %v1828_v46 }
  0x99   :  { %v477_v25 = vrot.slane %v476_v12, 2  ;;  %v457_v63 = vadd.f32 %v456_v23, %v255_v16  ;;  %2070 = vst [vmem:[#allocation47_spill] sm:$0xff] %v1754_v62  ;;  %v1760_v16 = vld [vmem:[#allocation6 + $0x118] sm:$0xff]  ;;  %v1762_v23 = vld [vmem:[#allocation6 + $0xb0] sm:$0xff]  ;;  %v501_v26 = vsel %vm340_vm1, %v285_v7, 0.0  ;;  %v1771_v28 = vld [vmem:[#allocation6 + $0x120] sm:$0xff] }
  0x9a   :  { %v513_v61 = vmul.f32 0.016666668, %v494_v42  ;;  %v499_v11 = vadd.f32 %v498_v39, %v279_v18  ;;  %2071 = vst [vmem:[#allocation48_spill] sm:$0xff] %v1760_v16  ;;  %v437_v0 = vrot.slane %v436_v40, 1  ;;  %v1769_v42 = vld [vmem:[#allocation6 + $0x38] sm:$0xff]  ;;  %2072 = vst [vmem:[#allocation49_spill] sm:$0xff] %v1771_v28  ;;  %v1211_v18 = vpack.c.bf16 %v1735_v56, %v1733_v38 }
  0x9b   :  { %v478_v27 = vadd.f32 %v477_v25, %v476_v12  ;;  %v458_v35 = vadd.f32 %v457_v63, %v258_v5  ;;  %v1773_v19 = vld [vmem:[#allocation6 + $0x128] sm:$0xff]  ;;  %v1780_v5 = vld [vmem:[#allocation6 + $0xc0] sm:$0xff]  ;;  %v1792_v38 = vld [vmem:[#allocation6 + $0x138] sm:$0xff] }
  0x9c   :  { %v619_v39 = vsel %vm617_vm2, %v513_v61, %v510_v24  ;;  %v500_v47 = vadd.f32 %v499_v11, %v282_v15  ;;  %v1782_v7 = vld [vmem:[#allocation6 + $0xc8] sm:$0xff]  ;;  %v1784_v25 = vld [vmem:[#allocation6 + $0x40] sm:$0xff]  ;;  %v438_v63 = vadd.f32 %v437_v0, %v436_v40  ;;  %v1790_v61 = vld [vmem:[#allocation6 + $0x130] sm:$0xff]  ;;  %2074 = vst [vmem:[#allocation51_spill] sm:$0xff] %v1792_v38  ;;  %v149_v38 = vshll.u32 %v1561_v58, 16 }
  0x9d   :  { %688 = vmatprep.mubr.f32.mxu0 %v619_v39  ;;  %v479_v6 = vrot.slane %v478_v27, 1  ;;  %v460_v14 = vadd.f32 %v459_v31, %v458_v35  ;;  %v1788_v15 = vld [vmem:[#allocation6 + $0x48] sm:$0xff]  ;;  %2073 = vst [vmem:[#allocation50_spill] sm:$0xff] %v1790_v61  ;;  %v1800_v35 = vld [vmem:[#allocation6 + $0xd0] sm:$0xff]  ;;  %v1802_v40 = vld [vmem:[#allocation6 + $0xd8] sm:$0xff]  ;;  %v158_v58 = vshll.u32 %v1569_v3, 16 }
  0x9e   :  { %v502_v56 = vadd.f32 %v501_v26, %v500_v47  ;;  %v1804_v31 = vld [vmem:[#allocation6 + $0x50] sm:$0xff]  ;;  %v509_v24 = vmul.f32 0.016666668, %v438_v63  ;;  %v1808_v47 = vld [vmem:[#allocation6 + $0x58] sm:$0xff]  ;;  %v1810_v11 = vld [vmem:[#allocation6 + $0x140] sm:$0xff]  ;;  %v182_v3 = vshll.u32 %v1602_v22, 16 }
  0x9f   :  { %v480_v39 = vadd.f32 %v479_v6, %v478_v27  ;;  %v461_v36 = vrot.slane %v460_v14, 4  ;;  %2075 = vst [vmem:[#allocation52_spill] sm:$0xff] %v1810_v11  ;;  %v1812_v12 = vld [vmem:[#allocation6 + $0x148] sm:$0xff]  ;;  %v1820_v27 = vld [vmem:[#allocation6 + $0xe0] sm:$0xff]  ;;  %v146_v6 = vshll.u32 %v1551_v52, 16  ;;  %v167_v11 = vshll.u32 %v1579_v8, 16 }
  0xa0   :  { %2076 = vst [vmem:[#allocation53_spill] sm:$0xff] %v1812_v12  ;;  %v503_v13 = vrot.slane %v502_v56, 4  ;;  %v1822_v63 = vld [vmem:[#allocation6 + $0xe8] sm:$0xff]  ;;  %v170_v12 = vshll.u32 %v1581_v9, 16  ;;  %v173_v52 = vshll.u32 %v1583_v10, 16  ;;  %v152_v8 = vshll.u32 %v1563_v59, 16 }
  0xa1   :  { %v512_v26 = vmul.f32 0.016666668, %v480_v39  ;;  %v462_v16 = vadd.f32 %v461_v36, %v460_v14  ;;  %v1830_v0 = vld [vmem:[#allocation6 + $0x68] sm:$0xff]  ;;  %v1838_v36 = vld [vmem:[#allocation6 + $0xf0] sm:$0xff]  ;;  %v1840_v39 = vld [vmem:[#allocation6 + $0xf8] sm:$0xff]  ;;  %v155_v9 = vshll.u32 %v1567_v2, 16  ;;  %v2080_v59 = vpack.c.bf16 %v1740_v30, %v1737_v1 }
  0xa2   :  { %v504_v62 = vadd.f32 %v503_v13, %v502_v56  ;;  %v1845_v13 = vld [vmem:[#allocation6 + $0x70] sm:$0xff]  ;;  %v1847_v56 = vld [vmem:[#allocation6 + $0x78] sm:$0xff]  ;;  %v1235_v61 = vpack.c.bf16 %v1840_v39, %v1838_v36  ;;  %v161_v10 = vshll.u32 %v1598_v20, 16  ;;  %v179_v2 = vshll.u32 %v1600_v21, 16 }
  0xa3   :  { %v618_v55 = vsel %vm617_vm2, %v512_v26, %v509_v24  ;;  %v463_v60 = vrot.slane %v462_v16, 2  ;;  %v2078_v24 = vpack.c.bf16 %v1728_v44, %v1726_v41  ;;  %v176_v44 = vshll.u32 %v1594_v17, 16 }
  0xa4   :  { %689 = vmatmul.mubr.f32.vlgmr.msra.gmra.mrb[0].mxu0 %v618_v55  ;;  %v505_v28 = vrot.slane %v504_v62, 2  ;;  %v188_v20 = vshll.u32 %v1611_v29, 16  ;;  %v145_v30 = vshll.u32 %v1617_v33, 16  ;;  %v185_v21 = vshll.u32 %v1620_v34, 16 }
  0xa5   :  { %1210 = vmatpush3.bf16.msra.mxu0 %v2078_v24  ;;  %v464_v26 = vadd.f32 %v463_v60, %v462_v16  ;;  %v2079_v60 = vshll.u32 %v1549_v51, 16  ;;  %v391_v16 = vadd.f32 %v170_v12, %v167_v11  ;;  %v2081_v51 = vpack.c.bf16 %v1748_v48, %v1746_v43 }
  0xa6   :  { %v506_v55 = vadd.f32 %v505_v28, %v504_v62  ;;  %1212 = vmatprep.subr.bf16.mxu0 %v1211_v18  ;;  %v164_v62 = vshll.u32 %v1571_v4, 16  ;;  %v142_v4 = vshll.u32 %v1615_v32, 16  ;;  %v2082_v43 = vpack.c.bf16 %v1752_v57, %v1750_v49 }
  0xa7   :  { %v465_v46 = vrot.slane %v464_v26, 1  ;;  %v349_v41 = vadd.f32 %v146_v6, %v2079_v60  ;;  %v392_v17 = vadd.f32 %v391_v16, %v173_v52  ;;  %v169_v6 = vshll.u32 %v1638_v54, 16 }
  0xa8   :  { %v507_v24 = vrot.slane %v506_v55, 1  ;;  %v355_v29 = vsel %vm340_vm1, %v164_v62, 0.0  ;;  %v148_v48 = vshll.u32 %v1622_v37, 16  ;;  %v2083_v33 = vpack.c.bf16 %v1764_v50, %v1762_v23  ;;  %v2088_v37 = vld [vmem:[#allocation45_spill] sm:$0xff] }
  0xa9   :  { %v466_v28 = vadd.f32 %v465_v46, %v464_v26  ;;  %1214 = vmatpush3.bf16.msra.mxu0 %v2080_v59  ;;  %v350_v18 = vadd.f32 %v349_v41, %v149_v38  ;;  %v393_v11 = vadd.f32 %v392_v17, %v176_v44  ;;  %v166_v38 = vshll.u32 %v1636_v53, 16  ;;  %v2084_v53 = vld [vmem:[#allocation18_spill] sm:$0xff]  ;;  %v2091_v50 = vld [vmem:[#allocation21_spill] sm:$0xff] }
  0xaa   :  { %v508_v14 = vadd.f32 %v507_v24, %v506_v55  ;;  %1216 = vmatprep.subr.bf16.mxu0 %v2081_v51  ;;  %v397_v34 = vsel %vm340_vm1, %v188_v20, 0.0  ;;  %v151_v54 = vshll.u32 %v2084_v53, 16  ;;  %v2086_v55 = vld [vmem:[#allocation20_spill] sm:$0xff]  ;;  %v2087_v44 = vld [vmem:[#allocation46_spill] sm:$0xff]  ;;  %v175_v23 = vshll.u32 %v2091_v50, 16  ;;  %v2092_v24 = vld [vmem:[#allocation27_spill] sm:$0xff] }
  0xab   :  { %v511_v46 = vmul.f32 0.016666668, %v466_v28  ;;  %v351_v12 = vadd.f32 %v350_v18, %v152_v8  ;;  %v394_v32 = vadd.f32 %v393_v11, %v179_v2  ;;  %v154_v8 = vshll.u32 %v2086_v55, 16  ;;  %v2090_v41 = vld [vmem:[#allocation22_spill] sm:$0xff]  ;;  %v2096_v51 = vld [vmem:[#allocation23_spill] sm:$0xff]  ;;  %v2099_v11 = vld [vmem:[#allocation24_spill] sm:$0xff] }
  0xac   :  { %v514_v1 = vmul.f32 0.016666668, %v508_v14  ;;  %v2085_v14 = vld [vmem:[#allocation19_spill] sm:$0xff]  ;;  %v2089_v60 = vpack.c.bf16 %v2087_v44, %v2088_v37  ;;  %v163_v16 = vshll.u32 %v2090_v41, 16  ;;  %v187_v62 = vshll.u32 %v2092_v24, 16  ;;  %v2111_v41 = vld [vmem:[#allocation32_spill] sm:$0xff] }
  0xad   :  { %1218 = vmatpush3.bf16.msra.mxu0 %v2082_v43  ;;  %v352_v22 = vadd.f32 %v351_v12, %v155_v9  ;;  %v172_v52 = vshll.u32 %v2085_v14, 16  ;;  %v395_v57 = vadd.f32 %v394_v32, %v182_v3  ;;  %v334_v9 = vadd.f32 %v145_v30, %v142_v4  ;;  %v2103_v32 = vld [vmem:[#allocation47_spill] sm:$0xff] }
  0xae   :  { %v620_v26 = vsel %vm617_vm2, %v514_v1, %v511_v46  ;;  %1220 = vmatprep.subr.bf16.mxu0 %v2083_v33  ;;  %v377_v28 = vadd.f32 %v169_v6, %v166_v38  ;;  %v2093_v59 = vmov 0.0   ;;  %v2094_v2 = vmov 0.0|0.0   ;;  %v2098_v46 = vld [vmem:[#allocation25_spill] sm:$0xff]  ;;  %v2100_v1 = vld [vmem:[#allocation26_spill] sm:$0xff]  ;;  %v2110_v37 = vld [vmem:[#allocation31_spill] sm:$0xff] }
  0xaf   :  { %1114 = vmatmul.mubr.f32.vlgmr.msra.gmra.mrb[0].mxu1 %v620_v26  ;;  %v353_v49 = vadd.f32 %v352_v22, %v158_v58  ;;  %v2095_v58 = vpack.c.bf16 %v1769_v42, %v1767_v45  ;;  %v396_v17 = vadd.f32 %v395_v57, %v185_v21  ;;  %v157_v3 = vshll.u32 %v2096_v51, 16  ;;  %v2101_v45 = vld [vmem:[#allocation28_spill] sm:$0xff]  ;;  %v2105_v33 = vld [vmem:[#allocation29_spill] sm:$0xff] }
  0xb0   :  { %1241 = vmatpush3.bf16.msra.mxu1 %v2089_v60  ;;  %1148 = vmatprep.mubr.msk.f32.mxu1 %vm1429_vm0, %v2093_v59  ;;  %v335_v20 = vadd.f32 %v334_v9, %v148_v48  ;;  %v2097_v4 = vpack.c.bf16 %v1782_v7, %v1780_v5  ;;  %v160_v12 = vshll.u32 %v2098_v46, 16  ;;  %v178_v30 = vshll.u32 %v2099_v11, 16  ;;  %v2102_v21 = vld [vmem:[#allocation48_spill] sm:$0xff]  ;;  %v2109_v9 = vld [vmem:[#allocation33_spill] sm:$0xff] }
  0xb1   :  { %1242 = vmatprep.subr.bf16.mxu1 %v2094_v2  ;;  %1222 = vmatpush3.bf16.msra.mxu0 %v2095_v58  ;;  %v354_v18 = vadd.f32 %v353_v49, %v161_v10  ;;  %v181_v38 = vshll.u32 %v2100_v1, 16  ;;  %v378_v6 = vadd.f32 %v377_v28, %v172_v52  ;;  %v398_v22 = vadd.f32 %v397_v34, %v396_v17  ;;  %v2107_v52 = vld [vmem:[#allocation30_spill] sm:$0xff]  ;;  %v2115_v59 = vld [vmem:[#allocation36_spill] sm:$0xff] }
  0xb2   :  { %1224 = vmatprep.subr.bf16.mxu0 %v2097_v4  ;;  %v184_v42 = vshll.u32 %v2101_v45, 16  ;;  %v336_v10 = vadd.f32 %v335_v20, %v151_v54  ;;  %v2104_v26 = vpack.c.bf16 %v2102_v21, %v2103_v32  ;;  %v341_v48 = vsel %vm340_vm1, %v163_v16, 0.0 }
  0xb3   :  { %v356_v43 = vadd.f32 %v355_v29, %v354_v18  ;;  %v379_v5 = vadd.f32 %v378_v6, %v175_v23  ;;  %v383_v7 = vsel %vm340_vm1, %v187_v62, 0.0  ;;  %v144_v53 = vshll.u32 %v2105_v33, 16  ;;  %v2117_v18 = vld [vmem:[#allocation35_spill] sm:$0xff] }
  0xb4   :  { %1244 = vmatpush3.bf16.msra.mxu1 %v2104_v26  ;;  %v2106_v29 = vpack.c.bf16 %v1788_v15, %v1784_v25  ;;  %v399_v14 = vrot.slane %v398_v22, 4  ;;  %v337_v54 = vadd.f32 %v336_v10, %v154_v8  ;;  %v147_v49 = vshll.u32 %v2107_v52, 16  ;;  %v2112_v15 = vld [vmem:[#allocation34_spill] sm:$0xff]  ;;  %v2113_v8 = vld [vmem:[#allocation49_spill] sm:$0xff]  ;;  %v2126_v33 = vld [vmem:[#allocation39_spill] sm:$0xff] }
  0xb5   :  { %1245 = vmatprep.subr.bf16.mxu1 %v2094_v2  ;;  %v357_v34 = vrot.slane %v356_v43, 4  ;;  %v2108_v57 = vpack.c.bf16 %v1802_v40, %v1800_v35  ;;  %v380_v55 = vadd.f32 %v379_v5, %v178_v30  ;;  %v150_v44 = vshll.u32 %v2109_v9, 16  ;;  %v2116_v40 = vld [vmem:[#allocation38_spill] sm:$0xff]  ;;  %v2120_v30 = vld [vmem:[#allocation40_spill] sm:$0xff]  ;;  %v2125_v26 = vld [vmem:[#allocation41_spill] sm:$0xff] }
  0xb6   :  { %1226 = vmatpush3.bf16.msra.mxu0 %v2106_v29  ;;  %v168_v60 = vshll.u32 %v2110_v37, 16  ;;  %v171_v16 = vshll.u32 %v2111_v41, 16  ;;  %v400_v23 = vadd.f32 %v399_v14, %v398_v22  ;;  %v338_v25 = vadd.f32 %v337_v54, %v157_v3  ;;  %v557_v29 = vld [vmem:[#allocation6 + $0x150] sm:$0xff] }
  0xb7   :  { %1228 = vmatprep.subr.bf16.mxu0 %v2108_v57  ;;  %v358_v50 = vadd.f32 %v357_v34, %v356_v43  ;;  %v153_v24 = vshll.u32 %v2112_v15, 16  ;;  %v2114_v62 = vpack.c.bf16 %v1773_v19, %v2113_v8  ;;  %v381_v28 = vadd.f32 %v380_v55, %v181_v38  ;;  %v2121_v38 = vld [vmem:[#allocation37_spill] sm:$0xff]  ;;  %v2130_v55 = vld [vmem:[#allocation43_spill] sm:$0xff]  ;;  %v2134_v8 = vld [vmem:[#allocation44_spill] sm:$0xff] }
  0xb8   :  { %v156_v35 = vshll.u32 %v2115_v59, 16  ;;  %v159_v58 = vshll.u32 %v2116_v40, 16  ;;  %v174_v17 = vshll.u32 %v2117_v18, 16  ;;  %v2118_v51 = vpack.c.bf16 %v1808_v47, %v1804_v31  ;;  %v2122_v31 = vld [vmem:[#allocation51_spill] sm:$0xff]  ;;  %v2123_v47 = vld [vmem:[#allocation50_spill] sm:$0xff]  ;;  %v558_v34 = vld [vmem:[#allocation6 + $0x158] sm:$0xff] }
  0xb9   :  { %1247 = vmatpush3.bf16.msra.mxu1 %v2114_v62  ;;  %v359_v3 = vrot.slane %v358_v50, 2  ;;  %v401_v20 = vrot.slane %v400_v23, 2  ;;  %v339_v4 = vadd.f32 %v338_v25, %v160_v12  ;;  %v363_v46 = vadd.f32 %v147_v49, %v144_v53  ;;  %v2129_v49 = vld [vmem:[#allocation42_spill] sm:$0xff] }
  0xba   :  { %1248 = vmatprep.subr.bf16.mxu1 %v2094_v2  ;;  %1230 = vmatpush3.bf16.msra.mxu0 %v2118_v51  ;;  %v2119_v19 = vpack.c.bf16 %v1822_v63, %v1820_v27  ;;  %v382_v11 = vadd.f32 %v381_v28, %v184_v42  ;;  %v162_v1 = vshll.u32 %v2120_v30, 16  ;;  %v177_v6 = vshll.u32 %v2121_v38, 16  ;;  %v2127_v42 = vld [vmem:[#allocation54_spill] sm:$0xff]  ;;  %v561_v30 = vld [vmem:[#allocation6 + $0x170] sm:$0xff] }
  0xbb   :  { %v405_v43 = vadd.f32 %v171_v16, %v168_v60  ;;  %v360_v22 = vadd.f32 %v359_v3, %v358_v50  ;;  %v402_v45 = vadd.f32 %v401_v20, %v400_v23  ;;  %v342_v10 = vadd.f32 %v341_v48, %v339_v4  ;;  %v2131_v16 = vld [vmem:[#allocation53_spill] sm:$0xff]  ;;  %v2132_v50 = vld [vmem:[#allocation52_spill] sm:$0xff]  ;;  %v560_v62 = vld [vmem:[#allocation6 + $0x168] sm:$0xff] }
  0xbc   :  { %1232 = vmatprep.subr.bf16.mxu0 %v2119_v19  ;;  %v364_v21 = vadd.f32 %v363_v46, %v150_v44  ;;  %v2124_v32 = vpack.c.bf16 %v2122_v31, %v2123_v47  ;;  %v384_v12 = vadd.f32 %v383_v7, %v382_v11  ;;  %v165_v5 = vshll.u32 %v2125_v26, 16  ;;  %v559_v15 = vld [vmem:[#allocation6 + $0x160] sm:$0xff] }
  0xbd   :  { %v180_v27 = vshll.u32 %v2126_v33, 16  ;;  %v406_v63 = vadd.f32 %v405_v43, %v174_v17  ;;  %v2128_v53 = vpack.c.bf16 %v1830_v0, %v2127_v42  ;;  %v361_v48 = vrot.slane %v360_v22, 1 }
  0xbe   :  { %1250 = vmatpush3.bf16.msra.mxu1 %v2124_v32  ;;  %v403_v14 = vrot.slane %v402_v45, 1  ;;  %v343_v54 = vrot.slane %v342_v10, 4  ;;  %v365_v52 = vadd.f32 %v364_v21, %v153_v24  ;;  %v385_v7 = vrot.slane %v384_v12, 4 }
  0xbf   :  { %1251 = vmatprep.subr.bf16.mxu1 %v2094_v2  ;;  %1234 = vmatpush3.bf16.msra.mxu0 %v2128_v53  ;;  %v183_v57 = vshll.u32 %v2129_v49, 16  ;;  %v189_v9 = vshll.u32 %v2130_v55, 16  ;;  %v407_v44 = vadd.f32 %v406_v63, %v177_v6  ;;  %v362_v37 = vadd.f32 %v361_v48, %v360_v22 }
  0xc0   :  { %1236 = vmatprep.subr.bf16.mxu0 %v1235_v61  ;;  %v404_v60 = vadd.f32 %v403_v14, %v402_v45  ;;  %v344_v0 = vadd.f32 %v343_v54, %v342_v10  ;;  %v366_v41 = vadd.f32 %v365_v52, %v156_v35  ;;  %v2133_v23 = vpack.c.bf16 %v2131_v16, %v2132_v50 }
  0xc1   :  { %v1255_v25 = vpack.c.bf16 %v558_v34, %v557_v29  ;;  %v386_v24 = vadd.f32 %v385_v7, %v384_v12  ;;  %v186_v36 = vshll.u32 %v2134_v8, 16  ;;  %v408_v61 = vadd.f32 %v407_v44, %v180_v27 }
  0xc2   :  { %1253 = vmatpush3.bf16.msra.mxu1 %v2133_v23  ;;  %v2135_v39 = vpack.c.bf16 %v1847_v56, %v1845_v13  ;;  %v420_v28 = vmul.f32 0.016666668, %v362_v37  ;;  %v423_v59 = vmul.f32 0.016666668, %v404_v60  ;;  %v345_v35 = vrot.slane %v344_v0, 2 }
  0xc3   :  { %1254 = vmatprep.subr.bf16.mxu1 %v2094_v2  ;;  %v367_v40 = vadd.f32 %v366_v41, %v159_v58  ;;  %v387_v18 = vrot.slane %v386_v24, 2  ;;  %v369_v17 = vsel %vm340_vm1, %v165_v5, 0.0  ;;  %v409_v51 = vadd.f32 %v408_v61, %v183_v57  ;;  %v562_v58 = vld [vmem:[#allocation6 + $0x178] sm:$0xff]  ;;  %v974_v41 = vld [vmem:[%s1999_s4] ss:$0 sm:$0xff] }
  0xc4   :  { %1238 = vmatpush3.bf16.msra.mxu0 %v2135_v39  ;;  %v771_v3 = vsel %vm617_vm2, %v423_v59, %v420_v28  ;;  %v346_v20 = vadd.f32 %v345_v35, %v344_v0  ;;  %v411_v46 = vsel %vm340_vm1, %v189_v9, 0.0  ;;  %v1258_v19 = vpack.c.bf16 %v560_v62, %v559_v15 }
  0xc5   :  { %v368_v4 = vadd.f32 %v367_v40, %v162_v1  ;;  %840 = vmatprep.mubr.f32.mxu0 %v771_v3  ;;  %v388_v13 = vadd.f32 %v387_v18, %v386_v24  ;;  %v410_v56 = vadd.f32 %v409_v51, %v186_v36  ;;  %v1261_v1 = vpack.c.bf16 %v562_v58, %v561_v30 }
  0xc6   :  { %1256 = vmatpush3.bf16.msra.mxu1 %v1255_v25  ;;  %v347_v11 = vrot.slane %v346_v20, 1 }
  0xc7   :  { %1257 = vmatprep.subr.bf16.mxu1 %v2094_v2  ;;  %v370_v38 = vadd.f32 %v369_v17, %v368_v4  ;;  %v389_v6 = vrot.slane %v388_v13, 1  ;;  %v412_v43 = vadd.f32 %v411_v46, %v410_v56 }
  0xc8   :  { %v348_v22 = vadd.f32 %v347_v11, %v346_v20 }
  0xc9   :  { %v371_v45 = vrot.slane %v370_v38, 4  ;;  %v390_v10 = vadd.f32 %v389_v6, %v388_v13  ;;  %v413_v21 = vrot.slane %v412_v43, 4 }
  0xca   :  { %1259 = vmatpush3.bf16.msra.mxu1 %v1258_v19  ;;  %v419_v31 = vmul.f32 0.016666668, %v348_v22 }
  0xcb   :  { %1260 = vmatprep.subr.bf16.mxu1 %v2094_v2  ;;  %v372_v47 = vadd.f32 %v371_v45, %v370_v38  ;;  %v422_v32 = vmul.f32 0.016666668, %v390_v10  ;;  %v414_v12 = vadd.f32 %v413_v21, %v412_v43 }
  0xcd   :  { %v373_v26 = vrot.slane %v372_v47, 2  ;;  %v770_v5 = vsel %vm617_vm2, %v422_v32, %v419_v31  ;;  %v415_v33 = vrot.slane %v414_v12, 2 }
  0xce   :  { %1262 = vmatpush3.bf16.msra.mxu1 %v1261_v1  ;;  %841 = vmatmul.mubr.f32.vlgmr.msra.gmra.mrb[2].mxu0 %v770_v5 }
  0xcf   :  { %v374_v27 = vadd.f32 %v373_v26, %v372_v47  ;;  %v416_v63 = vadd.f32 %v415_v33, %v414_v12 }
  0xd1   :  { %v375_v42 = vrot.slane %v374_v27, 1  ;;  %v417_v53 = vrot.slane %v416_v63, 1 }
  0xd3   :  { %v376_v29 = vadd.f32 %v375_v42, %v374_v27  ;;  %v418_v34 = vadd.f32 %v417_v53, %v416_v63 }
  0xd5   :  { %v421_v48 = vmul.f32 0.016666668, %v376_v29  ;;  %v424_v14 = vmul.f32 0.016666668, %v418_v34 }
  0xd7   :  { %v772_v54 = vsel %vm617_vm2, %v424_v14, %v421_v48 }
  0xd8   :  { %1149 = vmatmul.mubr.f32.vlgmr.msra.gmra.mrb[2].mxu1 %v772_v54 }
 0x177   :  { %v1009_v2 = vpop.f32.mrb[0].mxu0 }
 0x178   :  { %v1010_v52 = vpop.f32.mrb[1].mxu0 }
 0x179   :  { %v1011_v7 = vadd.f32 %v1010_v52, %v1009_v2 }
 0x182   :  { %v760_v49 = vpop.f32.mrb[0].mxu1 }
 0x183   :  { %v761_v57 = vadd.f32 %v1011_v7, %v760_v49  ;;  %v1115_v55 = vpop.f32.mrb[1].mxu1 }
 0x1a1   :  { %v1061_v9 = vpop.f32.mrb[2].mxu0 }
 0x1a2   :  { %v1062_v44 = vpop.f32.mrb[3].mxu0 }
 0x1a3   :  { %v1063_v37 = vadd.f32 %v1062_v44, %v1061_v9 }
 0x1a5   :  { %v843_v60 = vadd.f32 %v1063_v37, %v761_v57 }
 0x1ab   :  { %v912_v0 = vpop.f32.mrb[2].mxu1 }
 0x1ac   :  { %v913_v16 = vadd.f32 %v912_v0, %v843_v60  ;;  %v1150_v50 = vpop.f32.mrb[3].mxu1 }
 0x1ae   :  { %v923_v23 = vadd.f32 %v974_v41, %v913_v16 }
 0x1b0   :  { %v975_v25 = vmul.f32 -1.442695, %v923_v23 }
 0x1b2   :  { %1290 = vpow2.f32 %v975_v25 }
 0x1bc   :  { %v1291_v15 = vpop.eup %1290 }
 0x1bd   :  { %v927_v24 = vadd.f32 1.0, %v1291_v15 }
 0x1bf   :  { %1292 = vrcp.f32 %v927_v24 }
 0x1c9   :  { %v1293_v8 = vpop.eup %1292 }
 0x1ca   :  { %930 = vst [vmem:[#allocation11] sm:$0x3] %v1293_v8 }
 0x1cb   :  { %1383 = shalt.err (!%p1380_p9)
}
 0x1cc   :  { %s1384_s13 = scalar_lea.hbm %s2000_s5, 32 }
 0x1cd   :  { %p1385_p10 = scmp.ne.s32.totalorder %s2000_s5, %s1384_s13  ;;  %p1388_p11 = scmp.lt.u32.totalorder %s1384_s13, %s2000_s5 }
 0x1cf   :  { %p1390_p12 = pnand %p1388_p11, %p1385_p10 }
 0x1d1   :  { %1393 = shalt.err (!%p1390_p12)
}
 0x1d2   :  { %940 = dma.vmem_to_hbm [thread:$0]  %s938_s11, 32, %s2000_s5, [#allocation8]  }
 0x1d3   :  { %1410 = dma.done.wait [#allocation8], 32  }
 0x1d4   :  { %1411 = vsyncadd [#allocation8], 4294967264 }
 0x1d5   :  { %944 = vsyncpa [#allocation7], 1 }
 0x1d6   :  { %945 = vsyncpa [#allocation10], 1 }
 0x1d7   :  { %946 = vsyncpa [#allocation8], 1 }
 0x1d8   :  { %947 = vsyncmov [#allocation3] }
 0x1db   :  { %s948_s20 = vpop.sfrf %947 }
 0x1dc   :  { %p976_p13 = scmp.ne.s32.totalorder %s948_s20, 0 }
 0x1de   :  { %952 = shalt.err (%p976_p13)  }

</bundles_post_ra>
